<compile_context>
chip_gen: v7x
topology: tpu7x:2x2x1
jax: 0.10.0
libtpu: 0.0.40
codegen_flags: <defaults>
</compile_context>

<pallas_src>
import functools
import math

import jax
import jax.numpy as jnp
from jax import lax
from jax.experimental import pallas as pl
from jax.experimental.pallas import tpu as pltpu


def _pick_query_tile(S, max_tq=256):
    """Largest multiple-of-8 divisor of S that is <= max_tq (or S itself)."""
    if S <= max_tq:
        return S
    best = None
    for t in range(8, max_tq + 1, 8):
        if S % t == 0:
            best = t
    return best if best is not None else S


def _mha_kernel(q_ref, k_ref, v_ref, wq_ref, wk_ref, wv_ref, wo_ref, bo_ref,
                out_ref, *, n_heads, d_k, d_v, scale, mxu_dtype, approx_recip):
    # Refs (per grid step (b, qi)):
    #   q_ref          : (1, TQ, D)         query tile of one batch element
    #   k_ref, v_ref   : (1, S, D)          full keys/values of that batch elem
    #   wq_ref, wk_ref : (D, H*d_k)         all heads, lane-dense
    #   wv_ref         : (D, H*d_v)
    #   wo_ref         : (H*d_v, D_out)     output projection
    #   bo_ref         : (1, D_out)
    #   out_ref        : (1, TQ, D_out)
    q = q_ref[0].astype(mxu_dtype)          # (TQ, D)
    k = k_ref[0].astype(mxu_dtype)          # (S, D)
    v = v_ref[0].astype(mxu_dtype)          # (S, D)
    wq = wq_ref[...].astype(mxu_dtype)
    wk = wk_ref[...].astype(mxu_dtype)
    wv = wv_ref[...].astype(mxu_dtype)
    wo = wo_ref[...].astype(mxu_dtype)

    # Fused, lane-dense projections for all heads at once (f32 accumulation).
    # Fold 1/sqrt(d_k) into Q' (far fewer VPU multiplies than scaling scores).
    qp = (jnp.dot(q, wq, preferred_element_type=jnp.float32) * scale
          ).astype(mxu_dtype)                                   # (TQ, H*d_k)
    kp = jnp.dot(k, wk, preferred_element_type=jnp.float32
                 ).astype(mxu_dtype)                            # (S,  H*d_k)
    vp = jnp.dot(v, wv, preferred_element_type=jnp.float32
                 ).astype(mxu_dtype)                            # (S,  H*d_v)

    # Contract last dims directly — no transposed (S, d_k) temporary.
    dnums = (((1,), (1,)), ((), ()))

    head_outs = []
    for h in range(n_heads):                 # static unrolled loop over heads
        qh = qp[:, h * d_k:(h + 1) * d_k]    # (TQ, d_k)
        kh = kp[:, h * d_k:(h + 1) * d_k]    # (S,  d_k)
        vh = vp[:, h * d_v:(h + 1) * d_v]    # (S,  d_v)

        scores = lax.dot_general(qh, kh, dnums,
                                 preferred_element_type=jnp.float32)  # (TQ, S)
        m = jnp.max(scores, axis=-1, keepdims=True)
        e = jnp.exp(scores - m)
        s = jnp.sum(e, axis=-1, keepdims=True)
        p = e * pl.reciprocal(s, approx=approx_recip)            # (TQ, S)

        head_outs.append(
            jnp.dot(p.astype(mxu_dtype), vh,
                    preferred_element_type=jnp.float32))         # (TQ, d_v)

    # concat heads (== torch.cat(torch.split(...), dim=-1)) then output proj.
    cat = jnp.concatenate(head_outs, axis=-1).astype(mxu_dtype)  # (TQ, H*d_v)
    y = jnp.dot(cat, wo, preferred_element_type=jnp.float32)     # (TQ, D_out)
    y = y + bo_ref[...].astype(jnp.float32)

    out_ref[0] = y.astype(out_ref.dtype)


def multi_head_attention(q, k, v, w_q, w_k, w_v, w_proj, b_proj, *,
                         mxu_dtype=jnp.float32, approx_recip=True,
                         tq=None, vmem_limit_bytes=None):
    """Pallas implementation of MultiHeadAttention.forward (attn_mask=None).

    Args:
      q, k, v : (B, S, d_model) float32
      w_q, w_k: (n_heads, d_model, d_k)
      w_v     : (n_heads, d_model, d_v)
      w_proj  : (n_heads*d_v, d_model)   (== torch proj.weight.T)
      b_proj  : (d_model,)
    Returns:
      (B, S, d_model)
    """
    B, S, D = q.shape
    H, D2, d_k = w_q.shape
    assert D2 == D
    d_v = w_v.shape[-1]
    Dout = w_proj.shape[-1]
    assert w_proj.shape[0] == H * d_v

    # Lane-dense, head-major weight slabs: column j = h*d_k + e.
    wq_all = jnp.transpose(w_q, (1, 0, 2)).reshape(D, H * d_k)
    wk_all = jnp.transpose(w_k, (1, 0, 2)).reshape(D, H * d_k)
    wv_all = jnp.transpose(w_v, (1, 0, 2)).reshape(D, H * d_v)
    bo = b_proj.reshape(1, Dout)

    tq = tq if tq is not None else _pick_query_tile(S)
    assert S % tq == 0, "query tile must divide S"
    n_qt = S // tq

    scale = 1.0 / math.sqrt(d_k)

    kernel = functools.partial(
        _mha_kernel, n_heads=H, d_k=d_k, d_v=d_v, scale=scale,
        mxu_dtype=mxu_dtype, approx_recip=approx_recip)

    flops = int(
        2 * B * S * D * (H * d_k) * 2        # Q', K' projections
        + 2 * B * S * D * (H * d_v)          # V' projection
        + 2 * B * H * S * S * d_k            # Q K^T
        + 2 * B * H * S * S * d_v            # P V
        + 2 * B * S * (H * d_v) * Dout)      # output projection
    transcendentals = int(B * H * S * S + B * H * S)
    bytes_accessed = int(4 * (3 * B * S * D + B * S * Dout
                              + 2 * D * H * d_k + D * H * d_v
                              + H * d_v * Dout + Dout))

    grid_spec = pltpu.PrefetchScalarGridSpec(
        num_scalar_prefetch=0,
        grid=(B, n_qt),                       # query tiles innermost: k/v and
        in_specs=[                            # weights stay resident across qi
            pl.BlockSpec((1, tq, D), lambda b, qi: (b, qi, 0)),      # q tile
            pl.BlockSpec((1, S, D), lambda b, qi: (b, 0, 0)),        # k (full)
            pl.BlockSpec((1, S, D), lambda b, qi: (b, 0, 0)),        # v (full)
            pl.BlockSpec((D, H * d_k), lambda b, qi: (0, 0)),        # w_q all
            pl.BlockSpec((D, H * d_k), lambda b, qi: (0, 0)),        # w_k all
            pl.BlockSpec((D, H * d_v), lambda b, qi: (0, 0)),        # w_v all
            pl.BlockSpec((H * d_v, Dout), lambda b, qi: (0, 0)),     # w_proj
            pl.BlockSpec((1, Dout), lambda b, qi: (0, 0)),           # b_proj
        ],
        out_specs=pl.BlockSpec((1, tq, Dout), lambda b, qi: (b, qi, 0)),
    )

    return pl.pallas_call(
        kernel,
        out_shape=jax.ShapeDtypeStruct((B, S, Dout), q.dtype),
        grid_spec=grid_spec,
        compiler_params=pltpu.CompilerParams(
            dimension_semantics=("parallel", "arbitrary"),
            vmem_limit_bytes=vmem_limit_bytes),
        cost_estimate=pl.CostEstimate(
            flops=flops, transcendentals=transcendentals,
            bytes_accessed=bytes_accessed),
    )(q, k, v, wq_all, wk_all, wv_all, w_proj, bo)


def _reference(q, k, v, w_q, w_k, w_v, w_proj, b_proj):
    """Pure-JAX reference mirroring the PyTorch MultiHeadAttention.forward."""
    H, D, d_k = w_q.shape
    qp = jnp.einsum('bsd,hde->hbse', q, w_q)
    kp = jnp.einsum('bsd,hde->hbse', k, w_k)
    vp = jnp.einsum('bsd,hde->hbse', v, w_v)
    scores = jnp.einsum('hbqe,hbke->hbqk', qp, kp) / math.sqrt(d_k)
    attn = jax.nn.softmax(scores, axis=-1)
    out = jnp.einsum('hbqk,hbke->hbqe', attn, vp)            # (H, B, S, d_v)
    cat = jnp.concatenate([out[h] for h in range(H)], axis=-1)
    return cat @ w_proj + b_proj


if __name__ == "__main__":
    # Small shapes consistent with the module: d_model=32, n_heads=4 -> d_k=8.
    B, S, d_model, n_heads = 2, 8, 32, 4
    d_k = d_v = d_model // n_heads

    key = jax.random.PRNGKey(0)
    ks = jax.random.split(key, 8)
    q = jax.random.normal(ks[0], (B, S, d_model), dtype=jnp.float32)
    k = jax.random.normal(ks[1], (B, S, d_model), dtype=jnp.float32)
    v = jax.random.normal(ks[2], (B, S, d_model), dtype=jnp.float32)
    # Deterministic parameter init (torch.FloatTensor is uninitialized memory,
    # so any deterministic init is as faithful as it gets).
    w_q = 0.1 * jax.random.normal(ks[3], (n_heads, d_model, d_k), jnp.float32)
    w_k = 0.1 * jax.random.normal(ks[4], (n_heads, d_model, d_k), jnp.float32)
    w_v = 0.1 * jax.random.normal(ks[5], (n_heads, d_model, d_v), jnp.float32)
    w_proj = 0.1 * jax.random.normal(ks[6], (n_heads * d_v, d_model), jnp.float32)
    b_proj = 0.1 * jax.random.normal(ks[7], (d_model,), jnp.float32)

    ref = _reference(q, k, v, w_q, w_k, w_v, w_proj, b_proj)

    # 1) Exact f32 path (tight check).
    out_f32 = multi_head_attention(q, k, v, w_q, w_k, w_v, w_proj, b_proj,
                                   mxu_dtype=jnp.float32, approx_recip=False)
    jax.block_until_ready(out_f32)
    assert out_f32.shape == (B, S, d_model)
    assert jnp.allclose(out_f32, ref, atol=1e-4, rtol=1e-4)

    # 2) f32 with approximate (EUP) softmax reciprocal.
    out_approx = multi_head_attention(q, k, v, w_q, w_k, w_v, w_proj, b_proj,
                                      mxu_dtype=jnp.float32, approx_recip=True)
    jax.block_until_ready(out_approx)
    assert jnp.allclose(out_approx, ref, atol=1e-2, rtol=1e-2)

    # 3) bf16 MXU inputs (f32 accumulation) — the v6e/v7x production config.
    out_bf16 = multi_head_attention(q, k, v, w_q, w_k, w_v, w_proj, b_proj,
                                    mxu_dtype=jnp.bfloat16, approx_recip=True)
    jax.block_until_ready(out_bf16)
    assert jnp.allclose(out_bf16, ref, atol=3e-2, rtol=3e-2)

    print("KERNEL_OK")
</pallas_src>

<mosaic_0001>
module attributes {stable_mosaic.version = 11 : i64} {
  func.func @_mha_kernel(%arg0: i32, %arg1: i32, %arg2: memref<1x8x32xf32, #tpu.memory_space<vmem>>, %arg3: memref<1x8x32xf32, #tpu.memory_space<vmem>>, %arg4: memref<1x8x32xf32, #tpu.memory_space<vmem>>, %arg5: memref<32x32xf32, #tpu.memory_space<vmem>>, %arg6: memref<32x32xf32, #tpu.memory_space<vmem>>, %arg7: memref<32x32xf32, #tpu.memory_space<vmem>>, %arg8: memref<32x32xf32, #tpu.memory_space<vmem>>, %arg9: memref<1x32xf32, #tpu.memory_space<vmem>>, %arg10: memref<1x8x32xf32, #tpu.memory_space<vmem>>) attributes {dimension_semantics = [#tpu.dimension_semantics<parallel>, #tpu.dimension_semantics<arbitrary>], iteration_bounds = array<i64: 2, 1>, scalar_prefetch = 0 : i64, scratch_operands = 0 : i64, tpu.core_type = #tpu.core_type<tc>, window_params = [{transform_indices = @transform_0, window_bounds = array<i64: 1, 8, 32>}, {transform_indices = @transform_1, window_bounds = array<i64: 1, 8, 32>}, {transform_indices = @transform_2, window_bounds = array<i64: 1, 8, 32>}, {pipeline_mode = #tpu.pipeline_mode<synchronous>, transform_indices = @transform_3, window_bounds = array<i64: 32, 32>}, {pipeline_mode = #tpu.pipeline_mode<synchronous>, transform_indices = @transform_4, window_bounds = array<i64: 32, 32>}, {pipeline_mode = #tpu.pipeline_mode<synchronous>, transform_indices = @transform_5, window_bounds = array<i64: 32, 32>}, {pipeline_mode = #tpu.pipeline_mode<synchronous>, transform_indices = @transform_6, window_bounds = array<i64: 32, 32>}, {pipeline_mode = #tpu.pipeline_mode<synchronous>, transform_indices = @transform_7, window_bounds = array<i64: 1, 32>}, {transform_indices = @transform_8, window_bounds = array<i64: 1, 8, 32>}]} {
    %c0 = arith.constant 0 : index
    %c0_0 = arith.constant 0 : index
    %c0_1 = arith.constant 0 : index
    %0 = vector.load %arg2[%c0, %c0_0, %c0_1] : memref<1x8x32xf32, #tpu.memory_space<vmem>>, vector<1x8x32xf32>
    %1 = vector.shape_cast %0 : vector<1x8x32xf32> to vector<8x32xf32>
    %c0_2 = arith.constant 0 : index
    %c0_3 = arith.constant 0 : index
    %c0_4 = arith.constant 0 : index
    %2 = vector.load %arg3[%c0_2, %c0_3, %c0_4] : memref<1x8x32xf32, #tpu.memory_space<vmem>>, vector<1x8x32xf32>
    %3 = vector.shape_cast %2 : vector<1x8x32xf32> to vector<8x32xf32>
    %c0_5 = arith.constant 0 : index
    %c0_6 = arith.constant 0 : index
    %c0_7 = arith.constant 0 : index
    %4 = vector.load %arg4[%c0_5, %c0_6, %c0_7] : memref<1x8x32xf32, #tpu.memory_space<vmem>>, vector<1x8x32xf32>
    %5 = vector.shape_cast %4 : vector<1x8x32xf32> to vector<8x32xf32>
    %c0_8 = arith.constant 0 : index
    %c0_9 = arith.constant 0 : index
    %6 = vector.load %arg5[%c0_8, %c0_9] : memref<32x32xf32, #tpu.memory_space<vmem>>, vector<32x32xf32>
    %c0_10 = arith.constant 0 : index
    %c0_11 = arith.constant 0 : index
    %7 = vector.load %arg6[%c0_10, %c0_11] : memref<32x32xf32, #tpu.memory_space<vmem>>, vector<32x32xf32>
    %c0_12 = arith.constant 0 : index
    %c0_13 = arith.constant 0 : index
    %8 = vector.load %arg7[%c0_12, %c0_13] : memref<32x32xf32, #tpu.memory_space<vmem>>, vector<32x32xf32>
    %c0_14 = arith.constant 0 : index
    %c0_15 = arith.constant 0 : index
    %9 = vector.load %arg8[%c0_14, %c0_15] : memref<32x32xf32, #tpu.memory_space<vmem>>, vector<32x32xf32>
    %cst = arith.constant dense<0.000000e+00> : vector<8x32xf32>
    %10 = tpu.matmul %1, %6, %cst {dimension_numbers = #tpu.dot_dimension_numbers<[1], [0], [0], [1], [0, 0, 1, 1], [], []>} : vector<8x32xf32>, vector<32x32xf32>, vector<8x32xf32> -> vector<8x32xf32>
    %cst_16 = arith.constant 0.353553385 : f32
    %11 = vector.broadcast %cst_16 : f32 to vector<8x32xf32>
    %12 = arith.mulf %10, %11 : vector<8x32xf32>
    %cst_17 = arith.constant dense<0.000000e+00> : vector<8x32xf32>
    %13 = tpu.matmul %3, %7, %cst_17 {dimension_numbers = #tpu.dot_dimension_numbers<[1], [0], [0], [1], [0, 0, 1, 1], [], []>} : vector<8x32xf32>, vector<32x32xf32>, vector<8x32xf32> -> vector<8x32xf32>
    %cst_18 = arith.constant dense<0.000000e+00> : vector<8x32xf32>
    %14 = tpu.matmul %5, %8, %cst_18 {dimension_numbers = #tpu.dot_dimension_numbers<[1], [0], [0], [1], [0, 0, 1, 1], [], []>} : vector<8x32xf32>, vector<32x32xf32>, vector<8x32xf32> -> vector<8x32xf32>
    %15 = vector.extract_strided_slice %12 {offsets = [0, 0], sizes = [8, 8], strides = [1, 1]} : vector<8x32xf32> to vector<8x8xf32>
    %16 = vector.extract_strided_slice %13 {offsets = [0, 0], sizes = [8, 8], strides = [1, 1]} : vector<8x32xf32> to vector<8x8xf32>
    %17 = vector.extract_strided_slice %14 {offsets = [0, 0], sizes = [8, 8], strides = [1, 1]} : vector<8x32xf32> to vector<8x8xf32>
    %cst_19 = arith.constant dense<0.000000e+00> : vector<8x8xf32>
    %18 = tpu.matmul %15, %16, %cst_19 {dimension_numbers = #tpu.dot_dimension_numbers<[1], [1], [0], [0], [0, 0, 1, 0], [], []>} : vector<8x8xf32>, vector<8x8xf32>, vector<8x8xf32> -> vector<8x8xf32>
    %cst_20 = arith.constant dense<0xFF800000> : vector<8xf32>
    %19 = vector.multi_reduction <maximumf>, %18, %cst_20 [1] : vector<8x8xf32> to vector<8xf32>
    %20 = vector.shape_cast %19 : vector<8xf32> to vector<8x1xf32>
    %21 = vector.broadcast %20 : vector<8x1xf32> to vector<8x8xf32>
    %22 = arith.subf %18, %21 : vector<8x8xf32>
    %23 = math.exp %22 : vector<8x8xf32>
    %cst_21 = arith.constant dense<0.000000e+00> : vector<8xf32>
    %24 = vector.multi_reduction <add>, %23, %cst_21 [1] : vector<8x8xf32> to vector<8xf32>
    %25 = vector.shape_cast %24 : vector<8xf32> to vector<8x1xf32>
    %26 = tpu.reciprocal %25 : vector<8x1xf32> -> vector<8x1xf32>
    %27 = vector.broadcast %26 : vector<8x1xf32> to vector<8x8xf32>
    %28 = arith.mulf %23, %27 : vector<8x8xf32>
    %cst_22 = arith.constant dense<0.000000e+00> : vector<8x8xf32>
    %29 = tpu.matmul %28, %17, %cst_22 {dimension_numbers = #tpu.dot_dimension_numbers<[1], [0], [0], [1], [0, 0, 1, 1], [], []>} : vector<8x8xf32>, vector<8x8xf32>, vector<8x8xf32> -> vector<8x8xf32>
    %30 = vector.extract_strided_slice %12 {offsets = [0, 8], sizes = [8, 8], strides = [1, 1]} : vector<8x32xf32> to vector<8x8xf32>
    %31 = vector.extract_strided_slice %13 {offsets = [0, 8], sizes = [8, 8], strides = [1, 1]} : vector<8x32xf32> to vector<8x8xf32>
    %32 = vector.extract_strided_slice %14 {offsets = [0, 8], sizes = [8, 8], strides = [1, 1]} : vector<8x32xf32> to vector<8x8xf32>
    %cst_23 = arith.constant dense<0.000000e+00> : vector<8x8xf32>
    %33 = tpu.matmul %30, %31, %cst_23 {dimension_numbers = #tpu.dot_dimension_numbers<[1], [1], [0], [0], [0, 0, 1, 0], [], []>} : vector<8x8xf32>, vector<8x8xf32>, vector<8x8xf32> -> vector<8x8xf32>
    %cst_24 = arith.constant dense<0xFF800000> : vector<8xf32>
    %34 = vector.multi_reduction <maximumf>, %33, %cst_24 [1] : vector<8x8xf32> to vector<8xf32>
    %35 = vector.shape_cast %34 : vector<8xf32> to vector<8x1xf32>
    %36 = vector.broadcast %35 : vector<8x1xf32> to vector<8x8xf32>
    %37 = arith.subf %33, %36 : vector<8x8xf32>
    %38 = math.exp %37 : vector<8x8xf32>
    %cst_25 = arith.constant dense<0.000000e+00> : vector<8xf32>
    %39 = vector.multi_reduction <add>, %38, %cst_25 [1] : vector<8x8xf32> to vector<8xf32>
    %40 = vector.shape_cast %39 : vector<8xf32> to vector<8x1xf32>
    %41 = tpu.reciprocal %40 : vector<8x1xf32> -> vector<8x1xf32>
    %42 = vector.broadcast %41 : vector<8x1xf32> to vector<8x8xf32>
    %43 = arith.mulf %38, %42 : vector<8x8xf32>
    %cst_26 = arith.constant dense<0.000000e+00> : vector<8x8xf32>
    %44 = tpu.matmul %43, %32, %cst_26 {dimension_numbers = #tpu.dot_dimension_numbers<[1], [0], [0], [1], [0, 0, 1, 1], [], []>} : vector<8x8xf32>, vector<8x8xf32>, vector<8x8xf32> -> vector<8x8xf32>
    %45 = vector.extract_strided_slice %12 {offsets = [0, 16], sizes = [8, 8], strides = [1, 1]} : vector<8x32xf32> to vector<8x8xf32>
    %46 = vector.extract_strided_slice %13 {offsets = [0, 16], sizes = [8, 8], strides = [1, 1]} : vector<8x32xf32> to vector<8x8xf32>
    %47 = vector.extract_strided_slice %14 {offsets = [0, 16], sizes = [8, 8], strides = [1, 1]} : vector<8x32xf32> to vector<8x8xf32>
    %cst_27 = arith.constant dense<0.000000e+00> : vector<8x8xf32>
    %48 = tpu.matmul %45, %46, %cst_27 {dimension_numbers = #tpu.dot_dimension_numbers<[1], [1], [0], [0], [0, 0, 1, 0], [], []>} : vector<8x8xf32>, vector<8x8xf32>, vector<8x8xf32> -> vector<8x8xf32>
    %cst_28 = arith.constant dense<0xFF800000> : vector<8xf32>
    %49 = vector.multi_reduction <maximumf>, %48, %cst_28 [1] : vector<8x8xf32> to vector<8xf32>
    %50 = vector.shape_cast %49 : vector<8xf32> to vector<8x1xf32>
    %51 = vector.broadcast %50 : vector<8x1xf32> to vector<8x8xf32>
    %52 = arith.subf %48, %51 : vector<8x8xf32>
    %53 = math.exp %52 : vector<8x8xf32>
    %cst_29 = arith.constant dense<0.000000e+00> : vector<8xf32>
    %54 = vector.multi_reduction <add>, %53, %cst_29 [1] : vector<8x8xf32> to vector<8xf32>
    %55 = vector.shape_cast %54 : vector<8xf32> to vector<8x1xf32>
    %56 = tpu.reciprocal %55 : vector<8x1xf32> -> vector<8x1xf32>
    %57 = vector.broadcast %56 : vector<8x1xf32> to vector<8x8xf32>
    %58 = arith.mulf %53, %57 : vector<8x8xf32>
    %cst_30 = arith.constant dense<0.000000e+00> : vector<8x8xf32>
    %59 = tpu.matmul %58, %47, %cst_30 {dimension_numbers = #tpu.dot_dimension_numbers<[1], [0], [0], [1], [0, 0, 1, 1], [], []>} : vector<8x8xf32>, vector<8x8xf32>, vector<8x8xf32> -> vector<8x8xf32>
    %60 = vector.extract_strided_slice %12 {offsets = [0, 24], sizes = [8, 8], strides = [1, 1]} : vector<8x32xf32> to vector<8x8xf32>
    %61 = vector.extract_strided_slice %13 {offsets = [0, 24], sizes = [8, 8], strides = [1, 1]} : vector<8x32xf32> to vector<8x8xf32>
    %62 = vector.extract_strided_slice %14 {offsets = [0, 24], sizes = [8, 8], strides = [1, 1]} : vector<8x32xf32> to vector<8x8xf32>
    %cst_31 = arith.constant dense<0.000000e+00> : vector<8x8xf32>
    %63 = tpu.matmul %60, %61, %cst_31 {dimension_numbers = #tpu.dot_dimension_numbers<[1], [1], [0], [0], [0, 0, 1, 0], [], []>} : vector<8x8xf32>, vector<8x8xf32>, vector<8x8xf32> -> vector<8x8xf32>
    %cst_32 = arith.constant dense<0xFF800000> : vector<8xf32>
    %64 = vector.multi_reduction <maximumf>, %63, %cst_32 [1] : vector<8x8xf32> to vector<8xf32>
    %65 = vector.shape_cast %64 : vector<8xf32> to vector<8x1xf32>
    %66 = vector.broadcast %65 : vector<8x1xf32> to vector<8x8xf32>
    %67 = arith.subf %63, %66 : vector<8x8xf32>
    %68 = math.exp %67 : vector<8x8xf32>
    %cst_33 = arith.constant dense<0.000000e+00> : vector<8xf32>
    %69 = vector.multi_reduction <add>, %68, %cst_33 [1] : vector<8x8xf32> to vector<8xf32>
    %70 = vector.shape_cast %69 : vector<8xf32> to vector<8x1xf32>
    %71 = tpu.reciprocal %70 : vector<8x1xf32> -> vector<8x1xf32>
    %72 = vector.broadcast %71 : vector<8x1xf32> to vector<8x8xf32>
    %73 = arith.mulf %68, %72 : vector<8x8xf32>
    %cst_34 = arith.constant dense<0.000000e+00> : vector<8x8xf32>
    %74 = tpu.matmul %73, %62, %cst_34 {dimension_numbers = #tpu.dot_dimension_numbers<[1], [0], [0], [1], [0, 0, 1, 1], [], []>} : vector<8x8xf32>, vector<8x8xf32>, vector<8x8xf32> -> vector<8x8xf32>
    %75 = tpu.concatenate %29, %44, %59, %74 in 1 : vector<8x8xf32>, vector<8x8xf32>, vector<8x8xf32>, vector<8x8xf32> -> vector<8x32xf32>
    %cst_35 = arith.constant dense<0.000000e+00> : vector<8x32xf32>
    %76 = tpu.matmul %75, %9, %cst_35 {dimension_numbers = #tpu.dot_dimension_numbers<[1], [0], [0], [1], [0, 0, 1, 1], [], []>} : vector<8x32xf32>, vector<32x32xf32>, vector<8x32xf32> -> vector<8x32xf32>
    %c0_36 = arith.constant 0 : index
    %c0_37 = arith.constant 0 : index
    %77 = vector.load %arg9[%c0_36, %c0_37] : memref<1x32xf32, #tpu.memory_space<vmem>>, vector<1x32xf32>
    %78 = vector.broadcast %77 : vector<1x32xf32> to vector<8x32xf32>
    %79 = arith.addf %76, %78 : vector<8x32xf32>
    %c0_38 = arith.constant 0 : index
    %c0_39 = arith.constant 0 : index
    %c0_40 = arith.constant 0 : index
    %80 = vector.load %arg10[%c0_38, %c0_39, %c0_40] : memref<1x8x32xf32, #tpu.memory_space<vmem>>, vector<1x8x32xf32>
    %81 = vector.shape_cast %80 : vector<1x8x32xf32> to vector<8x32xf32>
    %82 = vector.shape_cast %79 : vector<8x32xf32> to vector<1x8x32xf32>
    tpu.vector_store %arg10[%c0_38, %c0_39, %c0_40], %82 {strides = array<i32>} : memref<1x8x32xf32, #tpu.memory_space<vmem>>, vector<1x8x32xf32>,
    return
  }
  func.func @transform_0(%arg0: i32, %arg1: i32) -> (i32, i32, i32) {
    %c0_i32 = arith.constant 0 : i32
    %c0_i32_0 = arith.constant 0 : i32
    return %arg0, %arg1, %c0_i32 : i32, i32, i32
  }
  func.func @transform_1(%arg0: i32, %arg1: i32) -> (i32, i32, i32) {
    %c0_i32 = arith.constant 0 : i32
    %c0_i32_0 = arith.constant 0 : i32
    %c0_i32_1 = arith.constant 0 : i32
    return %arg0, %c0_i32, %c0_i32_0 : i32, i32, i32
  }
  func.func @transform_2(%arg0: i32, %arg1: i32) -> (i32, i32, i32) {
    %c0_i32 = arith.constant 0 : i32
    %c0_i32_0 = arith.constant 0 : i32
    %c0_i32_1 = arith.constant 0 : i32
    return %arg0, %c0_i32, %c0_i32_0 : i32, i32, i32
  }
  func.func @transform_3(%arg0: i32, %arg1: i32) -> (i32, i32) {
    %c0_i32 = arith.constant 0 : i32
    %c0_i32_0 = arith.constant 0 : i32
    %c0_i32_1 = arith.constant 0 : i32
    return %c0_i32, %c0_i32_0 : i32, i32
  }
  func.func @transform_4(%arg0: i32, %arg1: i32) -> (i32, i32) {
    %c0_i32 = arith.constant 0 : i32
    %c0_i32_0 = arith.constant 0 : i32
    %c0_i32_1 = arith.constant 0 : i32
    return %c0_i32, %c0_i32_0 : i32, i32
  }
  func.func @transform_5(%arg0: i32, %arg1: i32) -> (i32, i32) {
    %c0_i32 = arith.constant 0 : i32
    %c0_i32_0 = arith.constant 0 : i32
    %c0_i32_1 = arith.constant 0 : i32
    return %c0_i32, %c0_i32_0 : i32, i32
  }
  func.func @transform_6(%arg0: i32, %arg1: i32) -> (i32, i32) {
    %c0_i32 = arith.constant 0 : i32
    %c0_i32_0 = arith.constant 0 : i32
    %c0_i32_1 = arith.constant 0 : i32
    return %c0_i32, %c0_i32_0 : i32, i32
  }
  func.func @transform_7(%arg0: i32, %arg1: i32) -> (i32, i32) {
    %c0_i32 = arith.constant 0 : i32
    %c0_i32_0 = arith.constant 0 : i32
    %c0_i32_1 = arith.constant 0 : i32
    return %c0_i32, %c0_i32_0 : i32, i32
  }
  func.func @transform_8(%arg0: i32, %arg1: i32) -> (i32, i32, i32) {
    %c0_i32 = arith.constant 0 : i32
    %c0_i32_0 = arith.constant 0 : i32
    return %arg0, %arg1, %c0_i32 : i32, i32, i32
  }
}

</mosaic_0001>

<bundles_post_ra>
// kernel: tpu_custom_call.1
= control target key start
LH: loop header
LB: loop body
LE: loop exit
PB: predicated region body
PF: predicated region fallthrough
CT: control target
= control target key end

     0   :  { %s2803_s0 = inlined_call_operand.hbm [shape: f32[2,8,32], index: 0, kind: input, shape index: {}]   ;;  %s2804_s1 = inlined_call_operand.hbm [shape: f32[2,8,32], index: 1, kind: input, shape index: {}]   ;;  %s2805_s2 = inlined_call_operand.hbm [shape: f32[2,8,32], index: 2, kind: input, shape index: {}]   ;;  %s2806_s3 = inlined_call_operand.hbm [shape: f32[32,32], index: 3, kind: input, shape index: {}]   ;;  %s2807_s4 = inlined_call_operand.hbm [shape: f32[32,32], index: 4, kind: input, shape index: {}]   ;;  %s2808_s5 = inlined_call_operand.hbm [shape: f32[32,32], index: 5, kind: input, shape index: {}]   ;;  %s2809_s6 = inlined_call_operand.hbm [shape: f32[32,32], index: 6, kind: input, shape index: {}]   ;;  %s2810_s7 = inlined_call_operand.vmem [shape: f32[1,32], index: 7, kind: input, shape index: {}]   ;;  %s2811_s8 = inlined_call_operand.hbm [shape: f32[2,8,32], index: 8, kind: output, shape index: {}]  }
   0x1   :  { %2836 = sst [smem:[#allocation26_spill]] %s2804_s1 }
   0x2   :  { %2837 = sst [smem:[#allocation27_spill]] %s2806_s3 }
   0x3   :  { %2838 = sst [smem:[#allocation28_spill]] %s2808_s5 }
   0x4   :  { %2839 = sst [smem:[#allocation29_spill]] %s2810_s7 }
   0x5   :  { %2840 = sst [smem:[#allocation30_spill]] %s2811_s8 }
   0x6   :  { %13 = vsyncpa [#allocation3], 0 }
   0x7   :  { %15 = vsyncpa [#allocation3 + $0x1], 0 }
   0x8   :  { %16 = vsyncpa [#allocation6], 0 }
   0x9   :  { %18 = vsyncpa [#allocation6 + $0x1], 0 }
   0xa   :  { %19 = vsyncpa [#allocation9], 0 }
   0xb   :  { %20 = vsyncpa [#allocation12], 0 }
   0xc   :  { %21 = vsyncpa [#allocation4], 0 }
   0xd   :  { %23 = vsyncpa [#allocation4 + $0x1], 0  ;;  %s2328_s27 = smov 0   ;;  %s2330_s28 = smov 0  }
   0xe   :  { %s2332_s29 = smov 0   ;;  %s2334_s30 = smov 0  }
   0xf   :  { %s2336_s9 = smov 0   ;;  %s2338_s10 = smov 0  }
  0x10 LB: > { %2841 = sst [smem:[#allocation20_spill]] %s2242_s27  ;;  %s2359_s11 = sadd.s32 4294967295, %s2262_s10   ;;  %s2262_s10 = sphi %s2338_s10, %s29_s10   ;;  %s2258_s9 = sphi %s2336_s9, %s2883_s9   ;;  %s2254_s30 = sphi %s2334_s30, %s2882_s30   ;;  %s2250_s29 = sphi %s2332_s29, %s2886_s29   ;;  %s2246_s28 = sphi %s2330_s28, %s2885_s28   ;;  %s2242_s27 = sphi %s2328_s27, %s2884_s27  }
  0x11   : > { %2842 = sst [smem:[#allocation21_spill]] %s2258_s9  ;;  %p1640_p0 = scmp.ge.s32.totalorder %s2262_s10, 1 }
  0x12   : > { %2843 = sst [smem:[#allocation22_spill]] %s2262_s10  ;;  %p2822_p1 = scmp.eq.s32.totalorder %s2359_s11, 0 }
  0x13   : > { %p259_p2 = scmp.lt.s32.totalorder %s2262_s10, 3  ;;  %s2264_s13 = smov [#allocation8]  }
  0x14   : > { %s271_s14 = sshll.u32 %s2264_s13, 4  ;;  %s2265_s16 = smov [#allocation11]   ;;  %s2368_s14 = int_to_ptr.vmem [resolvable:$true] %s271_s14 }
  0x15   : > { %p2364_p3 = pnand %p1640_p0, %p259_p2  ;;  %s297_s17 = sshll.u32 %s2265_s16, 4  ;;  %s2379_s17 = int_to_ptr.vmem [resolvable:$true] %s297_s17 }
  0x16   : > { %s2846_s3 = sld [smem:[#allocation27_spill]] }
  0x17   : > { %s2844_s12 = scalar_select %p2364_p3, 1, 0 }
  0x18   : > { %p1850_p4 = pneg %p2364_p3 }
  0x1a   : > { %p2375_p6 = pnand %p1850_p4, %p2822_p1 }
  0x1c   : > { %s2845_s15 = scalar_select %p2375_p6, 1, 0 }
  0x1d   : > { %s1966_s20 = scalar_lea.hbm %s2846_s3, 512  ;;  %p2389_p8 = pneg %p2375_p6 }
  0x1e   : > { %p1967_p7 = scmp.ne.s32.totalorder %s2846_s3, %s1966_s20  ;;  %p1973_p11 = scmp.lt.u32.totalorder %s1966_s20, %s2846_s3 }
  0x1f   : > { %s2847_s23 = scalar_select %p2389_p8, 1, 0 }
  0x20   : > { %p1969_p9 = pnand %p2389_p8, %p1967_p7 }
  0x22   : > { %p1970_p10 = pneg %p1969_p9 }
  0x24   : > { %p1975_p12 = pnand %p1973_p11, %p1970_p10 }
  0x26   : > { %1978 = shalt.err (!%p1975_p12)
}
  0x27   : > { %s1979_s26 = scalar_lea.vmem %s2368_s14, 512  ;;  %p1987_p4 = scmp.lt.s32.totalorder %s2368_s14, %s2368_s14 }
  0x28   : > { %p1980_p13 = scmp.ne.s32.totalorder %s2368_s14, %s1979_s26  ;;  %p1988_p5 = scmp.lt.s32.totalorder %s1979_s26, %s1979_s26 }
  0x2a   : > { %p1982_p0 = pnand %p1980_p13, %p2389_p8  ;;  %p1989_p7 = por %p1988_p5, %p1987_p4 }
  0x2c   : > { %p1983_p2 = pneg %p1982_p0 }
  0x2e   : > { %p1990_p9 = pnand %p1989_p7, %p1983_p2 }
  0x30   : > { %1993 = shalt.err (!%p1990_p9)
}
  0x31   : > { %s2813_s13 = smov 128   ;;  %s2815_s16 = smov 8  }
  0x32   : > { %1853 = dma.hbm_to_vmem [thread:$0]  (!%p2375_p6), %s2846_s3, 512, %s2368_s14, [#allocation9], %s2813_s13, %s2813_s13, %s2815_s16  }
  0x33   : > { %s2848_s5 = sld [smem:[#allocation28_spill]] }
  0x39   : > { %s1994_s22 = scalar_lea.hbm %s2848_s5, 512 }
  0x3a   : > { %p1995_p5 = scmp.ne.s32.totalorder %s2848_s5, %s1994_s22  ;;  %p2001_p12 = scmp.lt.u32.totalorder %s1994_s22, %s2848_s5 }
  0x3c   : > { %p1997_p10 = pnand %p1995_p5, %p2389_p8 }
  0x3e   : > { %p1998_p11 = pneg %p1997_p10 }
  0x40   : > { %p2003_p13 = pnand %p2001_p12, %p1998_p11 }
  0x42   : > { %2006 = shalt.err (!%p2003_p13)
}
  0x43   : > { %s2007_s14 = scalar_lea.vmem %s2379_s17, 512  ;;  %p2015_p7 = scmp.lt.s32.totalorder %s2379_s17, %s2379_s17 }
  0x44   : > { %p2008_p0 = scmp.ne.s32.totalorder %s2379_s17, %s2007_s14  ;;  %p2016_p9 = scmp.lt.s32.totalorder %s2007_s14, %s2007_s14 }
  0x46   : > { %p2010_p2 = pnand %p2008_p0, %p2389_p8  ;;  %p2017_p5 = por %p2016_p9, %p2015_p7 }
  0x48   : > { %p2011_p4 = pneg %p2010_p2 }
  0x4a   : > { %p2018_p10 = pnand %p2017_p5, %p2011_p4 }
  0x4c   : > { %2021 = shalt.err (!%p2018_p10)
}
  0x4d   : > { %1859 = dma.hbm_to_vmem [thread:$0]  (!%p2375_p6), %s2848_s5, 512, %s2379_s17, [#allocation12], %s2813_s13, %s2813_s13, %s2815_s16  }
  0x4e   : > { %s1639_s19 = sadd.s32 4294967294, %s2262_s10   ;;  %s41_s20 = sadd.s32 1, %s2258_s9 }
  0x4f   : > { %p43_p11 = scmp.ge.s32.totalorder %s41_s20, 2  ;;  %s50_s21 = sadd.s32 1, %s2250_s29 }
  0x50   : > { %p57_p12 = scmp.ne.s32.totalorder %s2250_s29, %s2246_s28  ;;  %p58_p13 = scmp.eq.s32.totalorder %s2262_s10, 0 }
  0x51   : > { %s2888_s20 = smov (%p43_p11, %s41_s20), 0  ;;  %p63_p2 = scmp.ne.s32.totalorder %s2246_s28, %s2242_s27 }
  0x52   : > { %2849 = sst [smem:[#allocation23_spill]] %s2888_s20  ;;  %p2447_p0 = por %p58_p13, %p57_p12 }
  0x53   : > { %s45_s17 = ssub.s32 %s2258_s9, %s2888_s20  ;;  %p246_p4 = scmp.eq.s32.totalorder %s2359_s11, 1 }
  0x54   : > { %p48_p7 = scmp.eq.s32.totalorder %s45_s17, 0  ;;  %p2458_p9 = por %p2822_p1, %p63_p2 }
  0x55   : > { %p2462_p5 = por %p246_p4, %p57_p12  ;;  %p252_p10 = scmp.eq.s32.totalorder %s1639_s19, 1 }
  0x56   : > { %s2851_s24 = scalar_select %p2458_p9, 1, 0 }
  0x57   : > { %s2852_s25 = scalar_select %p2462_p5, 1, 0 }
  0x58   : > { %s2467_s26 = scalar_select %p48_p7, %s2250_s29, %s50_s21  }
  0x59   : > { %p2469_p11 = por %p252_p10, %p63_p2  ;;  %p1881_p13 = scmp.lt.s32.totalorder %s2262_s10, 2 }
  0x5a   : > { %2853 = sst [smem:[#allocation24_spill]] %s2467_s26  ;;  %s2817_s8 = sand.u32 1, %s2250_s29  }
  0x5b   : > { %s2854_s14 = scalar_select %p2469_p11, 1, 0 }
  0x5c   : > { %s2476_s18 = sshll.u32 %s2258_s9, 7  ;;  %s2480_s17 = sshll.u32 %s2817_s8, 3 }
  0x5d   : > { %2855 = sst [smem:[#allocation25_spill]] %s2854_s14  ;;  %p2484_p12 = pnand %p1881_p13, %p2447_p0 }
  0x5e   : > { %s346_s19 = sand.u32 1, %s2262_s10   ;;  %s2857_s1 = sld [smem:[#allocation26_spill]] }
  0x5f   : > { %s2856_s13 = scalar_select %p2484_p12, 1, 0 }
  0x60   : > { %s350_s5 = scalar_lea.vmem [#allocation5], %s2480_s17  ;;  %s2498_s22 = scalar_lea.sflag [#allocation6], %s346_s19 }
  0x61   : > { %s357_s8 = sshll.u32 %s350_s5, 4  ;;  %p2504_p2 = pneg %p2484_p12  ;;  %s2496_s8 = int_to_ptr.vmem [resolvable:$true] %s357_s8 }
  0x63   : > { %s2858_s9 = scalar_select %p2504_p2, 1, 0 }
  0x64   : > { %s2493_s3 = scalar_lea.hbm %s2857_s1, %s2476_s18  ;;  %s2027_s26 = scalar_lea.hbm %s2857_s1, 256 }
  0x65   : > { %s2022_s20 = scalar_lea.hbm %s2493_s3, 128  ;;  %p2028_p10 = scmp.lt.u32.totalorder %s2493_s3, %s2857_s1 }
  0x66   : > { %p2023_p0 = scmp.ne.s32.totalorder %s2493_s3, %s2022_s20  ;;  %p2029_p13 = scmp.lt.u32.totalorder %s2027_s26, %s2022_s20 }
  0x67   : > { %p2031_p11 = scmp.lt.u32.totalorder %s2022_s20, %s2493_s3 }
  0x68   : > { %p2025_p4 = pnand %p2504_p2, %p2023_p0  ;;  %p2030_p1 = por %p2029_p13, %p2028_p10 }
  0x6a   : > { %p2026_p7 = pneg %p2025_p4  ;;  %p2032_p5 = por %p2031_p11, %p2030_p1 }
  0x6c   : > { %p2033_p9 = pnand %p2032_p5, %p2026_p7 }
  0x6e   : > { %2036 = shalt.err (!%p2033_p9)
}
  0x6f   : > { %s2037_s19 = scalar_lea.vmem %s2496_s8, 128  ;;  %s2268_s16 = smov [#allocation5]  }
  0x70   : > { %p2038_p0 = scmp.ne.s32.totalorder %s2496_s8, %s2037_s19  ;;  %s2042_s21 = sshll.u32 %s2268_s16, 4  ;;  %s2043_s21 = int_to_ptr.vmem [resolvable:$false] %s2042_s21 }
  0x71   : > { %s2044_s10 = scalar_lea.vmem %s2043_s21, 256  ;;  %p2045_p6 = scmp.lt.s32.totalorder %s2496_s8, %s2043_s21 }
  0x72   : > { %p2040_p4 = pnand %p2038_p0, %p2504_p2  ;;  %p2046_p8 = scmp.lt.s32.totalorder %s2044_s10, %s2037_s19 }
  0x74   : > { %p2041_p3 = pneg %p2040_p4  ;;  %p2047_p10 = por %p2046_p8, %p2045_p6 }
  0x76   : > { %p2048_p13 = pnand %p2047_p10, %p2041_p3 }
  0x78   : > { %2051 = shalt.err (!%p2048_p13)
}
  0x79   : > { %1869 = dma.hbm_to_vmem [thread:$0]  (!%p2484_p12), %s2493_s3, 128, %s2496_s8, %s2498_s22  }
  0x7a   : > { %s2269_s20 = smov [#allocation10]   ;;  %s2270_s5 = smov [#allocation13]  }
  0x7b   : > { %s284_s26 = sshll.u32 %s2269_s20, 4  ;;  %s310_s1 = sshll.u32 %s2270_s5, 4  ;;  %s285_s26 = int_to_ptr.vmem [resolvable:$true] %s284_s26  ;;  %s311_s1 = int_to_ptr.vmem [resolvable:$true] %s310_s1 }
  0x7c   : > { %s2052_s21 = scalar_lea.hbm %s2807_s4, 512  ;;  %p2859_p3 = scmp.ne.s32.totalorder %s2847_s23, 0 }
  0x7d   : > { %p2053_p1 = scmp.ne.s32.totalorder %s2807_s4, %s2052_s21  ;;  %p2059_p9 = scmp.lt.u32.totalorder %s2052_s21, %s2807_s4 }
  0x7f   : > { %p2055_p6 = pnand %p2053_p1, %p2859_p3 }
  0x81   : > { %p2056_p8 = pneg %p2055_p6 }
  0x83   : > { %p2061_p5 = pnand %p2059_p9, %p2056_p8 }
  0x85   : > { %2064 = shalt.err (!%p2061_p5)
}
  0x86   : > { %s2065_s3 = scalar_lea.vmem %s285_s26, 512  ;;  %p2073_p4 = scmp.lt.s32.totalorder %s285_s26, %s285_s26 }
  0x87   : > { %p2066_p11 = scmp.ne.s32.totalorder %s285_s26, %s2065_s3  ;;  %p2074_p10 = scmp.lt.s32.totalorder %s2065_s3, %s2065_s3 }
  0x89   : > { %p2068_p7 = pnand %p2066_p11, %p2859_p3  ;;  %p2075_p13 = por %p2074_p10, %p2073_p4 }
  0x8b   : > { %p2069_p0 = pneg %p2068_p7 }
  0x8d   : > { %p2076_p12 = pnand %p2075_p13, %p2069_p0 }
  0x8f   : > { %2079 = shalt.err (!%p2076_p12)
}
  0x90   : > { %p2860_p1 = scmp.ne.s32.totalorder %s2845_s15, 0  ;;  %s2861_s14 = smov 8  }
  0x91   : > { %s2862_s8 = smov 128   ;;  %s2080_s16 = scalar_lea.hbm %s2809_s6, 512 }
  0x92   : > { %1856 = dma.hbm_to_vmem [thread:$0]  (!%p2860_p1), %s2807_s4, 512, %s285_s26, [#allocation9], %s2862_s8, %s2862_s8, %s2861_s14  }
  0x93   : > { %p2081_p6 = scmp.ne.s32.totalorder %s2809_s6, %s2080_s16  ;;  %p2087_p9 = scmp.lt.u32.totalorder %s2080_s16, %s2809_s6 }
  0x95   : > { %p2083_p12 = pnand %p2081_p6, %p2859_p3 }
  0x97   : > { %p2084_p8 = pneg %p2083_p12 }
  0x99   : > { %p2089_p5 = pnand %p2087_p9, %p2084_p8 }
  0x9b   : > { %2092 = shalt.err (!%p2089_p5)
}
  0x9c   : > { %s2093_s7 = scalar_lea.vmem %s311_s1, 512  ;;  %p2101_p4 = scmp.lt.s32.totalorder %s311_s1, %s311_s1 }
  0x9d   : > { %p2094_p11 = scmp.ne.s32.totalorder %s311_s1, %s2093_s7  ;;  %p2102_p10 = scmp.lt.s32.totalorder %s2093_s7, %s2093_s7 }
  0x9f   : > { %p2096_p7 = pnand %p2094_p11, %p2859_p3  ;;  %p2103_p13 = por %p2102_p10, %p2101_p4 }
  0xa1   : > { %p2097_p0 = pneg %p2096_p7 }
  0xa3   : > { %p2104_p2 = pnand %p2103_p13, %p2097_p0 }
  0xa5   : > { %2107 = shalt.err (!%p2104_p2)
}
  0xa6   : > { %1862 = dma.hbm_to_vmem [thread:$0]  (!%p2860_p1), %s2809_s6, 512, %s311_s1, [#allocation12], %s2862_s8, %s2862_s8, %s2861_s14  }
  0xa7   : > { %s2574_s5 = scalar_lea.hbm %s2803_s0, %s2476_s18  ;;  %s331_s15 = scalar_lea.vmem [#allocation2], %s2480_s17 }
  0xa8   : > { %s339_s16 = sshll.u32 %s331_s15, 4  ;;  %s2583_s10 = scalar_lea.hbm %s2805_s2, %s2476_s18  ;;  %s2577_s16 = int_to_ptr.vmem [resolvable:$true] %s339_s16 }
  0xa9   : > { %s2863_s3 = sand.u32 1, %s2250_s29   ;;  %s2108_s14 = scalar_lea.hbm %s2574_s5, 128 }
  0xaa   : > { %s328_s1 = scalar_lea.sflag [#allocation3], %s2863_s3  ;;  %p2109_p2 = scmp.ne.s32.totalorder %s2574_s5, %s2108_s14 }
  0xab   : > { %p2864_p3 = scmp.ne.s32.totalorder %s2858_s9, 0  ;;  %s2113_s26 = scalar_lea.hbm %s2803_s0, 256 }
  0xac   : > { %p2114_p12 = scmp.lt.u32.totalorder %s2574_s5, %s2803_s0  ;;  %p2115_p8 = scmp.lt.u32.totalorder %s2113_s26, %s2108_s14 }
  0xad   : > { %p2111_p1 = pnand %p2109_p2, %p2864_p3  ;;  %p2117_p5 = scmp.lt.u32.totalorder %s2108_s14, %s2574_s5 }
  0xae   : > { %p2116_p9 = por %p2115_p8, %p2114_p12 }
  0xaf   : > { %p2112_p6 = pneg %p2111_p1 }
  0xb0   : > { %p2118_p11 = por %p2117_p5, %p2116_p9 }
  0xb2   : > { %p2119_p7 = pnand %p2118_p11, %p2112_p6 }
  0xb4   : > { %2122 = shalt.err (!%p2119_p7)
}
  0xb5   : > { %s2123_s18 = scalar_lea.vmem %s2577_s16, 128  ;;  %s2271_s20 = smov [#allocation2]  }
  0xb6   : > { %p2124_p0 = scmp.ne.s32.totalorder %s2577_s16, %s2123_s18  ;;  %s2128_s15 = sshll.u32 %s2271_s20, 4  ;;  %s2129_s15 = int_to_ptr.vmem [resolvable:$false] %s2128_s15 }
  0xb7   : > { %s2130_s21 = scalar_lea.vmem %s2129_s15, 256  ;;  %p2131_p13 = scmp.lt.s32.totalorder %s2577_s16, %s2129_s15 }
  0xb8   : > { %p2126_p4 = pnand %p2124_p0, %p2864_p3  ;;  %p2132_p2 = scmp.lt.s32.totalorder %s2130_s21, %s2123_s18 }
  0xba   : > { %p2127_p10 = pneg %p2126_p4  ;;  %p2133_p1 = por %p2132_p2, %p2131_p13 }
  0xbc   : > { %p2134_p12 = pnand %p2133_p1, %p2127_p10 }
  0xbe   : > { %2137 = shalt.err (!%p2134_p12)
}
  0xbf   : > { %p2865_p6 = scmp.ne.s32.totalorder %s2856_s13, 0  ;;  %s368_s19 = scalar_lea.vmem [#allocation7], %s2480_s17 }
  0xc0   : > { %s375_s3 = sshll.u32 %s368_s19, 4  ;;  %s2138_s14 = scalar_lea.hbm %s2583_s10, 128  ;;  %s376_s3 = int_to_ptr.vmem [resolvable:$true] %s375_s3 }
  0xc1   : > { %1866 = dma.hbm_to_vmem [thread:$0]  (!%p2865_p6), %s2574_s5, 128, %s2577_s16, %s328_s1  }
  0xc2   : > { %p2139_p8 = scmp.ne.s32.totalorder %s2583_s10, %s2138_s14  ;;  %s2143_s26 = scalar_lea.hbm %s2805_s2, 256 }
  0xc3   : > { %p2144_p11 = scmp.lt.u32.totalorder %s2583_s10, %s2805_s2  ;;  %p2145_p7 = scmp.lt.u32.totalorder %s2143_s26, %s2138_s14 }
  0xc4   : > { %p2141_p9 = pnand %p2139_p8, %p2864_p3  ;;  %p2147_p4 = scmp.lt.u32.totalorder %s2138_s14, %s2583_s10 }
  0xc5   : > { %p2146_p0 = por %p2145_p7, %p2144_p11 }
  0xc6   : > { %p2142_p5 = pneg %p2141_p9 }
  0xc7   : > { %p2148_p10 = por %p2147_p4, %p2146_p0 }
  0xc9   : > { %p2149_p13 = pnand %p2148_p10, %p2142_p5 }
  0xcb   : > { %2152 = shalt.err (!%p2149_p13)
}
  0xcc   : > { %s2153_s17 = scalar_lea.vmem %s376_s3, 128  ;;  %s2272_s5 = smov [#allocation7]  }
  0xcd   : > { %p2154_p2 = scmp.ne.s32.totalorder %s376_s3, %s2153_s17  ;;  %s2158_s16 = sshll.u32 %s2272_s5, 4  ;;  %s2159_s16 = int_to_ptr.vmem [resolvable:$false] %s2158_s16 }
  0xce   : > { %s2160_s1 = scalar_lea.vmem %s2159_s16, 256  ;;  %p2161_p8 = scmp.lt.s32.totalorder %s376_s3, %s2159_s16 }
  0xcf   : > { %p2156_p1 = pnand %p2154_p2, %p2864_p3  ;;  %p2162_p9 = scmp.lt.s32.totalorder %s2160_s1, %s2153_s17 }
  0xd1   : > { %p2157_p12 = pneg %p2156_p1  ;;  %p2163_p6 = por %p2162_p9, %p2161_p8 }
  0xd3   : > { %p2164_p7 = pnand %p2163_p6, %p2157_p12 }
  0xd5   : > { %2167 = shalt.err (!%p2164_p7)
}
  0xd6   : > { %p2866_p11 = scmp.ne.s32.totalorder %s2856_s13, 0  ;;  %p2867_p5 = scmp.ne.s32.totalorder %s2844_s12, 0 }
  0xd7   : > { %s2630_s9 = sand.u32 (!%p2867_p5), 1, %s2246_s28   ;;  %p2868_p3 = scmp.ne.s32.totalorder (!%p2867_p5), %s2851_s24, 0 }
  0xd8   : > { %1872 = dma.hbm_to_vmem [thread:$0]  (!%p2866_p11), %s2583_s10, 128, %s376_s3, %s2498_s22  }
  0xd9   : > { %384 = sbr.rel (%p2867_p5) target bundleno = 2138 (0x85a), region = 52  ;;  %s2633_s18 = sshll.u32 (!%p2867_p5), %s2630_s9, 3 }
  0xda   : > { %s387_s20 = scalar_lea.sflag (!%p2867_p5), [#allocation3], %s2630_s9  ;;  %s390_s15 = scalar_lea.vmem (!%p2867_p5), [#allocation2], %s2633_s18 }
  0xe0   : > { %2221 = dma.done.wait (%p2868_p3), %s387_s20, 128  }
  0xe1   : > { %2223 = vsyncadd (%p2868_p3), %s387_s20, 4294967168  ;;  %s395_s12 = sand.u32 1, %s2359_s11   ;;  %s399_s22 = scalar_lea.vmem [#allocation5], %s2633_s18 }
  0xe2   : > { %s396_s13 = scalar_lea.sflag [#allocation6], %s395_s12 }
  0xe3   : > { %2225 = dma.done.wait (%p2868_p3), %s396_s13, 256  }
  0xe4   : > { %2227 = vsyncadd (%p2868_p3), %s396_s13, 4294967040  ;;  %s408_s10 = scalar_lea.vmem [#allocation7], %s2633_s18  ;;  %p2869_p6 = scmp.eq.s32.totalorder %s2359_s11, 0 }
  0xe6   : > { %2229 = dma.done.wait (%p2869_p6), [#allocation9], 1024   ;;  %p2870_p0 = pmov %p2869_p6 }
  0xe8   : > { %2231 = vsyncadd (%p2870_p0), [#allocation9], 4294966272  ;;  %p2871_p4 = pmov %p2870_p0 }
  0xe9   : > { %p2872_p10 = pmov %p2870_p0 }
  0xea   : > { %2233 = dma.done.wait (%p2871_p4), [#allocation12], 1024  }
  0xeb   : > { %2235 = vsyncadd (%p2872_p10), [#allocation12], 4294966272  ;;  %v2273_v0 = vmov 0.0|0.0   ;;  %vm2274_vm0 = vmmov 0   ;;  %v2275_v1 = vmov 0.0   ;;  %v474_v2 = vld [vmem:[#allocation10] sm:$0xff] }
  0xec   : > { %1808 = vmatprep.subr.bf16.mxu1 %v2273_v0  ;;  %1802 = vmatprep.subr.bf16.mxu0 %v2273_v0  ;;  %v475_v3 = vld [vmem:[#allocation10 + $0x8] sm:$0xff]  ;;  %v470_v4 = vld [vmem:[#allocation8] sm:$0xff]  ;;  %v476_v7 = vld [vmem:[#allocation10 + $0x10] sm:$0xff]  ;;  %vm486_vm1 = vcmask 261120   ;;  %vm707_vm2 = vcmask 64512   ;;  %s2276_s11 = smov 120  }
  0xed   : > { %1737 = vmatprep.mubr.msk.f32.mxu1 %vm2274_vm0, %v2275_v1  ;;  %1726 = vmatprep.mubr.msk.f32.mxu0 %vm2274_vm0, %v2275_v1  ;;  %v1809_v5 = vpack.c.bf16 %v475_v3, %v474_v2  ;;  %v471_v6 = vld [vmem:[#allocation8 + $0x8] sm:$0xff]  ;;  %v477_v8 = vld [vmem:[#allocation10 + $0x18] sm:$0xff]  ;;  %v472_v10 = vld [vmem:[#allocation8 + $0x10] sm:$0xff]  ;;  %s2277_s24 = smov 112   ;;  %s2278_s21 = smov 104   ;;  %vm1377_vm3 = vcmask 130048  }
  0xee   : > { %v1803_v9 = vpack.c.bf16 %v471_v6, %v470_v4  ;;  %v473_v11 = vld [vmem:[#allocation8 + $0x18] sm:$0xff]  ;;  %v1812_v12 = vpack.c.bf16 %v477_v8, %v476_v7  ;;  %v468_v14 = vld [vmem:[%s399_s22] sm:$0xff]  ;;  %v480_v23 = vld [vmem:[#allocation11 + $0x10] sm:$0xff]  ;;  %s2279_s19 = smov 8   ;;  %s2280_s3 = smov 16   ;;  %vm1379_vm4 = vcmask 195584  }
  0xef   : > { %1810 = vmatpush3.bf16.msra.mxu1 %v1809_v5  ;;  %v1806_v13 = vpack.c.bf16 %v473_v11, %v472_v10  ;;  %v467_v15 = vld [vmem:[%s390_s15] sm:$0xff]  ;;  %v478_v21 = vld [vmem:[#allocation11] sm:$0xff]  ;;  %v479_v22 = vld [vmem:[#allocation11 + $0x8] sm:$0xff]  ;;  %s2281_s14 = smov 24   ;;  %s2873_s26 = sld [smem:[#allocation29_spill]] }
  0xf0   : > { %1804 = vmatpush3.bf16.msra.mxu0 %v1803_v9  ;;  %1811 = vmatprep.subr.bf16.mxu1 %v2273_v0  ;;  %v1815_v24 = vpack.c.bf16 %v479_v22, %v478_v21  ;;  %v481_v25 = vld [vmem:[#allocation11 + $0x18] sm:$0xff]  ;;  %s1679_s27 = sshll.u32 %s2254_s30, 7  ;;  %s466_s23 = scalar_lea.vmem [#allocation14], %s2633_s18 }
  0xf1   : > { %1805 = vmatprep.subr.bf16.mxu0 %v2273_v0  ;;  %v1818_v26 = vpack.c.bf16 %v481_v25, %v480_v23  ;;  %v469_v27 = vld [vmem:[%s408_s10] sm:$0xff]  ;;  %v482_v23 = vld [vmem:[#allocation13] sm:$0xff]  ;;  %s1477_s17 = sshll.u32 %s466_s23, 4  ;;  %s2874_s1 = sld [smem:[#allocation30_spill]]  ;;  %s2755_s17 = int_to_ptr.vmem [resolvable:$true] %s1477_s17 }
  0xf2   : > { %s1463_s15 = scalar_lea.sflag [#allocation4], %s2630_s9  ;;  %s2168_s12 = scalar_lea.vmem %s2755_s17, 128 }
  0xf3   : > { %1813 = vmatpush3.bf16.msra.mxu1 %v1812_v12  ;;  %p2169_p13 = scmp.ne.s32.totalorder %s2755_s17, %s2168_s12  ;;  %p2875_p2 = scmp.ne.s32.totalorder %s2852_s25, 0 }
  0xf4   : > { %1807 = vmatpush3.bf16.msra.mxu0 %v1806_v13  ;;  %1751 = vmatprep.subr.mxu1 %v2275_v1  ;;  %s2282_s30 = smov [#allocation14]  }
  0xf5   : > { %1814 = vmatprep.subr.bf16.mxu0 %v2273_v0  ;;  %p2170_p1 = pnand %p2169_p13, %p2875_p2  ;;  %s2172_s18 = sshll.u32 %s2282_s30, 4  ;;  %s2173_s18 = int_to_ptr.vmem [resolvable:$false] %s2172_s18 }
  0xf6   : > { %1738 = vmatmul.mubr.msk.f32.vlgmr.msra.gmra.mrb[0].mxu1 %vm486_vm1, %v468_v14  ;;  %s2174_s13 = scalar_lea.vmem %s2173_s18, 256  ;;  %p2175_p8 = scmp.lt.s32.totalorder %s2755_s17, %s2173_s18 }
  0xf7   : > { %1727 = vmatmul.mubr.msk.f32.vlgmr.msra.gmra.mrb[0].mxu0 %vm486_vm1, %v467_v15  ;;  %1753 = vmatprep.mubr.msk.f32.mxu1 %vm2274_vm0, %v2275_v1  ;;  %s2753_s20 = scalar_lea.hbm %s2874_s1, %s1679_s27  ;;  %p2171_p12 = pneg %p2170_p1 }
  0xf8   : > { %1748 = vmatprep.mubr.msk.f32.mxu0 %vm2274_vm0, %v2275_v1  ;;  %1816 = vmatpush3.bf16.msra.mxu0 %v1815_v24  ;;  %v483_v24 = vld [vmem:[#allocation13 + $0x8] sm:$0xff]  ;;  %p2176_p9 = scmp.lt.s32.totalorder %s2174_s13, %s2168_s12 }
  0xf9   : > { %1817 = vmatprep.subr.bf16.mxu0 %v2273_v0  ;;  %v1821_v25 = vpack.c.bf16 %v483_v24, %v482_v23 }
  0xfa   : > { %p2177_p7 = por %p2176_p9, %p2175_p8 }
  0xfc   : > { %1819 = vmatpush3.bf16.msra.mxu0 %v1818_v26  ;;  %v484_v26 = vld [vmem:[#allocation13 + $0x10] sm:$0xff]  ;;  %p2178_p11 = pnand %p2177_p7, %p2171_p12 }
  0xfd   : > { %1771 = vmatprep.subr.mxu0 %v2275_v1 }
  0xff   : > { %1749 = vmatmul.mubr.msk.f32.vlgmr.msra.gmra.mrb[2].mxu0 %vm486_vm1, %v469_v27  ;;  %v485_v27 = vld [vmem:[#allocation13 + $0x18] sm:$0xff] }
 0x100   : > { %1773 = vmatprep.mubr.msk.f32.mxu0 %vm2274_vm0, %v2275_v1 }
 0x1c9   : > { %v630_v16 = vpop.f32.mrb[0].mxu1 }
 0x1ca   : > { %870 = vrot.lane.b32.xlu1 %v630_v16, %s2276_s11  ;;  %v556_v17 = vpop.f32.mrb[0].mxu0  ;;  %v1739_v18 = vpop.f32.mrb[1].mxu1  ;;  %1752 = vmatpush3.xpose.msk.msra.mxu1 %vm707_vm2, %v630_v16 }
 0x1cb   : > { %v560_v19 = vmul.f32 0.35355338, %v556_v17  ;;  %v1728_v20 = vpop.f32.mrb[1].mxu0  ;;  %1756 = vmatprep.subr.mxu1 %v2275_v1 }
 0x1cd   : > { %1754 = vmatmul.mubr.msk.f32.vlgmr.msra.gmra.mrb[2].mxu1 %vm707_vm2, %v560_v19 }
 0x1ce   : > { %868 = vrot.lane.b32.xlu1 %v560_v19, %s2276_s11  ;;  %1758 = vmatprep.mubr.msk.f32.mxu1 %vm2274_vm0, %v2275_v1 }
 0x1d2   : > { %1034 = vrot.lane.b32.xlu1 %v560_v19, %s2277_s24  ;;  %v2695_v36 = vpop.f32.mrb[2].mxu0 }
 0x1d3   : > { %v1750_v37 = vpop.f32.mrb[3].mxu0  ;;  %1757 = vmatpush3.msra.mxu1 %v2695_v36 }
 0x1d4   : > { %1761 = vmatprep.subr.mxu1 %v2275_v1 }
 0x1d6   : > { %1201 = vrot.lane.b32.xlu1 %v630_v16, %s2278_s21 }
 0x1da   : > { %1199 = vrot.lane.b32.xlu1 %v560_v19, %s2278_s21 }
 0x23c   : > { %v871_v38 = vpop.permute.xlu1 %870 }
 0x240   : > { %v869_v39 = vpop.permute.xlu1 %868 }
 0x244   : > { %v1035_v40 = vpop.permute.xlu1 %1034 }
 0x248   : > { %v1202_v43 = vpop.permute.xlu1 %1201 }
 0x24c   : > { %v1200_v45 = vpop.permute.xlu1 %1199 }
 0x2a0   : > { %v780_v28 = vpop.f32.mrb[2].mxu1 }
 0x2a1   : > { %v1755_v29 = vpop.f32.mrb[3].mxu1  ;;  %v784_v30 = vsel %vm707_vm2, %v780_v28, -inf }
 0x2a2   : > { %785 = vmax.xlane.f32.xlu0 %v784_v30 }
 0x32f   : > { %v786_v31 = vpop.xlane.xlu0 %785 }
 0x330   : > { %v787_v32 = vsub.f32 %v780_v28, %v786_v31  ;;  %v1824_v28 = vpack.c.bf16 %v485_v27, %v484_v26 }
 0x332   : > { %v788_v33 = vmul.f32 1.442695, %v787_v32 }
 0x334   : > { %1950 = vpow2.f32 %v788_v33 }
 0x33e   : > { %v1951_v34 = vpop.eup %1950 }
 0x33f   : > { %v790_v35 = vsel %vm707_vm2, %v1951_v34, 0.0 }
 0x340   : > { %791 = vadd.xlane.f32.xlu0 %v790_v35 }
 0x356   : > { %1036 = vrot.lane.b32.xlu0 %v630_v16, %s2277_s24 }
 0x3cd   : > { %v792_v41 = vpop.xlane.xlu0 %791 }
 0x3ce   : > { %1952 = vrcp.f32 %v792_v41 }
 0x3d1   : > { %v1037_v42 = vpop.permute.xlu0 %1036 }
 0x3d2   : > { %1772 = vmatpush3.xpose.msk.msra.mxu0 %vm707_vm2, %v1037_v42 }
 0x3d3   : > { %1781 = vmatprep.subr.mxu0 %v2275_v1 }
 0x3d5   : > { %1774 = vmatmul.mubr.msk.f32.vlgmr.msra.gmra.mrb[4].mxu0 %vm707_vm2, %v1035_v40 }
 0x3d6   : > { %1782 = vmatpush3.xpose.msk.msra.mxu0 %vm707_vm2, %v1202_v43  ;;  %1783 = vmatprep.mubr.msk.f32.mxu0 %vm2274_vm0, %v2275_v1 }
 0x3d7   : > { %1820 = vmatprep.subr.bf16.mxu0 %v2273_v0 }
 0x3d8   : > { %v1953_v44 = vpop.eup %1952 }
 0x3d9   : > { %v794_v46 = vmul.f32 %v1953_v44, %v1951_v34  ;;  %1784 = vmatmul.mubr.msk.f32.vlgmr.msra.gmra.mrb[6].mxu0 %vm707_vm2, %v1200_v45 }
 0x3da   : > { %1799 = vmatprep.mubr.msk.f32.mxu0 %vm2274_vm0, %v2275_v1  ;;  %1822 = vmatpush3.bf16.msra.mxu0 %v1821_v25 }
 0x3db   : > { %1759 = vmatmul.mubr.msk.f32.vlgmr.msra.gmra.mrb[4].mxu1 %vm707_vm2, %v794_v46  ;;  %1823 = vmatprep.subr.bf16.mxu0 %v2273_v0 }
 0x3dc   : > { %1762 = vmatpush3.xpose.msk.msra.mxu1 %vm707_vm2, %v871_v38  ;;  %1763 = vmatprep.mubr.msk.f32.mxu1 %vm2274_vm0, %v2275_v1 }
 0x3dd   : > { %1766 = vmatprep.subr.mxu1 %v2275_v1 }
 0x3de   : > { %1825 = vmatpush3.bf16.msra.mxu0 %v1824_v28 }
 0x3df   : > { %1764 = vmatmul.mubr.msk.f32.vlgmr.msra.gmra.mrb[6].mxu1 %vm707_vm2, %v869_v39  ;;  %v1676_v39 = vld [vmem:[%s2873_s26] ss:$0 sm:$0xff] }
 0x3e0   : > { %1768 = vmatprep.mubr.msk.f32.mxu1 %vm2274_vm0, %v2275_v1 }
 0x4a8   : > { %v1108_v47 = vpop.f32.mrb[4].mxu0 }
 0x4a9   : > { %v1775_v48 = vpop.f32.mrb[5].mxu0  ;;  %v1112_v49 = vsel %vm707_vm2, %v1108_v47, -inf }
 0x4aa   : > { %1113 = vmax.xlane.f32.xlu0 %v1112_v49 }
 0x4ac   : > { %v1273_v50 = vpop.f32.mrb[6].mxu0 }
 0x4ad   : > { %v1785_v51 = vpop.f32.mrb[7].mxu0  ;;  %v1277_v57 = vsel %vm707_vm2, %v1273_v50, -inf }
 0x4ae   : > { %v2719_v52 = vpop.f32.mrb[4].mxu1 }
 0x4af   : > { %v1760_v53 = vpop.f32.mrb[5].mxu1 }
 0x4b2   : > { %v942_v54 = vpop.f32.mrb[6].mxu1 }
 0x4b3   : > { %v1765_v55 = vpop.f32.mrb[7].mxu1  ;;  %v946_v56 = vsel %vm707_vm2, %v942_v54, -inf }
 0x4b4   : > { %947 = vmax.xlane.f32.xlu1 %v946_v56 }
 0x4b8   : > { %1278 = vmax.xlane.f32.xlu1 %v1277_v57 }
 0x537   : > { %v1114_v58 = vpop.xlane.xlu0 %1113 }
 0x538   : > { %v1115_v59 = vsub.f32 %v1108_v47, %v1114_v58 }
 0x53a   : > { %v1116_v60 = vmul.f32 1.442695, %v1115_v59 }
 0x53c   : > { %1954 = vpow2.f32 %v1116_v60 }
 0x541   : > { %v948_v61 = vpop.xlane.xlu1 %947 }
 0x542   : > { %v949_v7 = vsub.f32 %v942_v54, %v948_v61 }
 0x544   : > { %v950_v8 = vmul.f32 1.442695, %v949_v7 }
 0x545   : > { %v1279_v62 = vpop.xlane.xlu1 %1278 }
 0x546   : > { %v1955_v63 = vpop.eup %1954  ;;  %v1280_v2 = vsub.f32 %v1273_v50, %v1279_v62 }
 0x547   : > { %v1118_v3 = vsel %vm707_vm2, %v1955_v63, 0.0 }
 0x548   : > { %v1281_v4 = vmul.f32 1.442695, %v1280_v2  ;;  %1119 = vadd.xlane.f32.xlu0 %v1118_v3 }
 0x54a   : > { %1956 = vpow2.f32 %v1281_v4 }
 0x54b   : > { %1958 = vpow2.f32 %v950_v8 }
 0x554   : > { %v1957_v5 = vpop.eup %1956 }
 0x555   : > { %v1283_v6 = vsel %vm707_vm2, %v1957_v5, 0.0  ;;  %v1959_v9 = vpop.eup %1958 }
 0x556   : > { %1284 = vadd.xlane.f32.xlu1 %v1283_v6  ;;  %v952_v10 = vsel %vm707_vm2, %v1959_v9, 0.0 }
 0x55e   : > { %958 = vrot.lane.b32.xlu0 %v2695_v36, %s2276_s11 }
 0x567   : > { %1123 = vrot.lane.b32.xlu1 %v2695_v36, %s2277_s24 }
 0x58b   : > { %953 = vadd.xlane.f32.xlu1 %v952_v10 }
 0x59c   : > { %1288 = vrot.lane.b32.xlu1 %v2695_v36, %s2278_s21 }
 0x5d5   : > { %v1120_v11 = vpop.xlane.xlu0 %1119 }
 0x5d9   : > { %v959_v12 = vpop.permute.xlu0 %958 }
 0x5da   : > { %1767 = vmatpush3.msra.mxu1 %v959_v12 }
 0x5db   : > { %1776 = vmatprep.subr.mxu1 %v2275_v1 }
 0x5e3   : > { %v1285_v13 = vpop.xlane.xlu1 %1284 }
 0x5e7   : > { %v1124_v14 = vpop.permute.xlu1 %1123 }
 0x618   : > { %v954_v15 = vpop.xlane.xlu1 %953 }
 0x619   : > { %1960 = vrcp.f32 %v954_v15 }
 0x61a   : > { %1962 = vrcp.f32 %v1120_v11 }
 0x61b   : > { %1964 = vrcp.f32 %v1285_v13 }
 0x61c   : > { %v1289_v21 = vpop.permute.xlu1 %1288 }
 0x623   : > { %v1961_v16 = vpop.eup %1960 }
 0x624   : > { %v956_v17 = vmul.f32 %v1961_v16, %v1959_v9  ;;  %v1963_v18 = vpop.eup %1962 }
 0x625   : > { %v1122_v19 = vmul.f32 %v1963_v18, %v1955_v63  ;;  %v1965_v20 = vpop.eup %1964 }
 0x626   : > { %1769 = vmatmul.mubr.msk.f32.vlgmr.msra.gmra.mrb[8].mxu1 %vm707_vm2, %v956_v17  ;;  %v1287_v22 = vmul.f32 %v1965_v20, %v1957_v5 }
 0x627   : > { %1777 = vmatpush3.msra.mxu1 %v1124_v14  ;;  %1778 = vmatprep.mubr.msk.f32.mxu1 %vm2274_vm0, %v2275_v1 }
 0x628   : > { %1786 = vmatprep.subr.mxu1 %v2275_v1 }
 0x62a   : > { %1779 = vmatmul.mubr.msk.f32.vlgmr.msra.gmra.mrb[10].mxu1 %vm707_vm2, %v1122_v19 }
 0x62b   : > { %1787 = vmatpush3.msra.mxu1 %v1289_v21  ;;  %1788 = vmatprep.mubr.msk.f32.mxu1 %vm2274_vm0, %v2275_v1 }
 0x62e   : > { %1789 = vmatmul.mubr.msk.f32.vlgmr.msra.gmra.mrb[12].mxu1 %vm707_vm2, %v1287_v22 }
 0x6f9   : > { %v1030_v29 = vpop.f32.mrb[8].mxu1 }
 0x6fa   : > { %1365 = vrot.lane.b32.xlu0 %v1030_v29, %s2279_s19  ;;  %v1770_v30 = vpop.f32.mrb[9].mxu1 }
 0x6fd   : > { %v1195_v31 = vpop.f32.mrb[10].mxu1 }
 0x6fe   : > { %1369 = vrot.lane.b32.xlu1 %v1195_v31, %s2280_s3  ;;  %v1780_v1 = vpop.f32.mrb[11].mxu1 }
 0x701   : > { %v1360_v32 = vpop.f32.mrb[12].mxu1 }
 0x702   : > { %1373 = vrot.lane.b32.xlu0 %v1360_v32, %s2281_s14  ;;  %v1790_v33 = vpop.f32.mrb[13].mxu1 }
 0x76c   : > { %v1366_v34 = vpop.permute.xlu0 %1365 }
 0x76d   : > { %v1376_v35 = vsel %vm707_vm2, %v2719_v52, %v1366_v34 }
 0x770   : > { %v1370_v0 = vpop.permute.xlu1 %1369 }
 0x771   : > { %v1378_v36 = vsel %vm1377_vm3, %v1376_v35, %v1370_v0 }
 0x774   : > { %v1374_v37 = vpop.permute.xlu0 %1373 }
 0x775   : > { %v1380_v38 = vsel %vm1379_vm4, %v1378_v36, %v1374_v37 }
 0x776   : > { %1800 = vmatmul.mubr.msk.f32.vlgmr.msra.gmra.mrb[8].mxu0 %vm486_vm1, %v1380_v38 }
 0x849   : > { %v1457_v40 = vpop.f32.mrb[8].mxu0 }
 0x84a   : > { %v1458_v41 = vadd.f32 %v1676_v39, %v1457_v40  ;;  %v1801_v42 = vpop.f32.mrb[9].mxu0 }
 0x84c   : > { %1461 = vst.msk [vmem:[%s466_s23] sm:$0xff] %vm486_vm1, %v1458_v41 }
 0x84d   : > { %2181 = shalt.err (!%p2178_p11)
}
 0x84e   : > { %s2182_s9 = scalar_lea.hbm %s2753_s20, 128  ;;  %s2186_s11 = scalar_lea.hbm %s2874_s1, 256 }
 0x84f   : > { %p2183_p5 = scmp.ne.s32.totalorder %s2753_s20, %s2182_s9  ;;  %p2187_p0 = scmp.lt.u32.totalorder %s2753_s20, %s2874_s1 }
 0x850   : > { %p2188_p4 = scmp.lt.u32.totalorder %s2186_s11, %s2182_s9  ;;  %p2190_p13 = scmp.lt.u32.totalorder %s2182_s9, %s2753_s20 }
 0x851   : > { %p2184_p3 = pnand %p2183_p5, %p2875_p2 }
 0x852   : > { %p2189_p10 = por %p2188_p4, %p2187_p0 }
 0x853   : > { %p2185_p6 = pneg %p2184_p3 }
 0x854   : > { %p2191_p1 = por %p2190_p13, %p2189_p10 }
 0x856   : > { %p2192_p12 = pnand %p2191_p1, %p2185_p6 }
 0x858   : > { %2195 = shalt.err (!%p2192_p12)
}
 0x859   : > { %1848 = dma.vmem_to_hbm [thread:$0]  (%p2875_p2), %s2755_s17, 128, %s2753_s20, %s1463_s15  }
 0x85a PF: > { %s2876_s19 = sld [smem:[#allocation20_spill]]  ;;  %s2877_s3 = sld [smem:[#allocation25_spill]] }
 0x85b   : > { %s2878_s14 = sld [smem:[#allocation22_spill]] }
 0x860   : > { %s1489_s8 = sand.u32 1, %s2876_s19   ;;  %p2879_p8 = scmp.ne.s32.totalorder %s2877_s3, 0 }
 0x861   : > { %p2880_p9 = scmp.ge.s32.totalorder %s2878_s14, 2  ;;  %s1490_s7 = scalar_lea.sflag [#allocation4], %s1489_s8 }
 0x863   : > { %p1874_p7 = pnand %p2880_p9, %p2879_p8 }
 0x865   : > { %2237 = dma.done.wait (!%p1874_p7), %s1490_s7, 128  }
 0x866   : > { %2239 = vsyncadd (!%p1874_p7), %s1490_s7, 4294967168  ;;  %s29_s10 = sadd.s32 1, %s2878_s14   ;;  %s2881_s25 = sld [smem:[#allocation24_spill]] }
 0x867   : > { %p26_p11 = scmp.ge.s32.totalorder %s29_s10, 4   ;;  %s2882_s30 = sld [smem:[#allocation21_spill]] }
 0x868   : > { %s2883_s9 = sld [smem:[#allocation23_spill]]  ;;  %s2884_s27 = smov %s2246_s28 }
 0x869   : > { %s2885_s28 = smov %s2250_s29  ;;  %28 = sbr.rel (!%p26_p11) target bundleno = 16 (0x10), region = 137 }
 0x86c   : > { %s2886_s29 = smov %s2881_s25 }
 0x870   :  { %1495 = vsyncpa [#allocation3], 1 }
 0x871   :  { %1497 = vsyncpa [#allocation3 + $0x1], 1 }
 0x872   :  { %1498 = vsyncpa [#allocation6], 1 }
 0x873   :  { %1500 = vsyncpa [#allocation6 + $0x1], 1 }
 0x874   :  { %1501 = vsyncpa [#allocation9], 1 }
 0x875   :  { %1502 = vsyncpa [#allocation12], 1 }
 0x876   :  { %1503 = vsyncpa [#allocation4], 1 }
 0x877   :  { %1505 = vsyncpa [#allocation4 + $0x1], 1 }

</bundles_post_ra>
